<compile_context>
chip_gen: v5e
topology: v5e:2x2
jax: 0.10.0
libtpu: 0.0.40
codegen_flags: <defaults>
</compile_context>

<pallas_src>
import functools

import jax
import jax.numpy as jnp
from jax.experimental import pallas as pl
from jax.experimental.pallas import tpu as pltpu

SELU_ALPHA = 1.6732632423543772
SELU_SCALE = 1.0507009873554805
NUM_HIDDEN = 256
SUBLANE = 8          # f32 sublane count
MAX_TILE_B = 1024    # batch rows per grid step for large batches


def _round_up(x, m):
    return (x + m - 1) // m * m


def _use_bf16_selu():
    """bf16 SELU on v6e/v7x (bf16 VALU/EUP); f32 SELU on v5e and older."""
    try:
        kind = jax.devices()[0].device_kind.lower()
    except Exception:
        return True
    return not any(tag in kind for tag in ("v2", "v3", "v4", "v5"))


def _actor_kernel(x_ref, w1_ref, b1_ref, w2_ref, b2_ref, w3_ref, b3_ref,
                  w4_ref, b4_ref, o_ref, *, bf16_selu):
    """Fused 4-layer MLP over one batch tile.

    bf16 MXU operands with f32 accumulation. SELU's `scale` factor is folded
    into the *next* layer's weights (see prepare_kernel_params), so only the
    where(x > 0, x, alpha*(exp(x)-1)) core remains here.
    """
    def selu_core(h):
        if bf16_selu:
            h = h.astype(jnp.bfloat16)
            # clamp the dead branch so exp never overflows in bf16
            neg = SELU_ALPHA * (jnp.exp(jnp.minimum(h, 0)) - 1)
            return jnp.where(h > 0, h, neg)
        # f32 path (v5e): +inf in the dead branch is discarded by the where.
        neg = SELU_ALPHA * (jnp.exp(h) - 1.0)
        return jnp.where(h > 0, h, neg).astype(jnp.bfloat16)

    x = x_ref[...].astype(jnp.bfloat16)
    h = jnp.dot(x, w1_ref[...], preferred_element_type=jnp.float32) + b1_ref[...]
    h = selu_core(h)
    h = jnp.dot(h, w2_ref[...], preferred_element_type=jnp.float32) + b2_ref[...]
    h = selu_core(h)
    h = jnp.dot(h, w3_ref[...], preferred_element_type=jnp.float32) + b3_ref[...]
    h = selu_core(h)
    out = jnp.dot(h, w4_ref[...], preferred_element_type=jnp.float32) + b4_ref[...]
    o_ref[...] = out.astype(o_ref.dtype)


def init_actor_params(key, num_state, num_actions):
    """Deterministic init matching the PyTorch module:
    kaiming_normal_(mode='fan_in', nonlinearity='linear') -> std = 1/sqrt(fan_in),
    biases zero. Weights stored transposed (in, out) so each layer is x @ W + b."""
    dims = [(num_state, NUM_HIDDEN),
            (NUM_HIDDEN, NUM_HIDDEN),
            (NUM_HIDDEN, NUM_HIDDEN),
            (NUM_HIDDEN, num_actions)]
    params = {}
    keys = jax.random.split(key, len(dims))
    for i, ((fan_in, fan_out), k) in enumerate(zip(dims, keys), start=1):
        std = 1.0 / jnp.sqrt(jnp.float32(fan_in))
        params[f"w{i}"] = jax.random.normal(k, (fan_in, fan_out), jnp.float32) * std
        params[f"b{i}"] = jnp.zeros((1, fan_out), jnp.float32)
    return params


def prepare_kernel_params(params):
    """bf16 weights for the MXU (biases stay f32, added to the f32 accumulator).
    SELU's scale constant is folded into w2/w3/w4 so the kernel only computes
    the elu core: where(x>0, x, alpha*(exp(x)-1))."""
    return {
        "w1": params["w1"].astype(jnp.bfloat16),
        "b1": params["b1"].astype(jnp.float32),
        "w2": (SELU_SCALE * params["w2"]).astype(jnp.bfloat16),
        "b2": params["b2"].astype(jnp.float32),
        "w3": (SELU_SCALE * params["w3"]).astype(jnp.bfloat16),
        "b3": params["b3"].astype(jnp.float32),
        "w4": (SELU_SCALE * params["w4"]).astype(jnp.bfloat16),
        "b4": params["b4"].astype(jnp.float32),
    }


def actor_forward(state, kparams):
    """Pallas forward pass.

    state: (B, num_state) or (num_state,) float32
    kparams: output of prepare_kernel_params (bf16 weights, scale folded).
    """
    if state.ndim == 1:
        state = state[None, :]
    B, num_state = state.shape
    num_actions = kparams["w4"].shape[1]

    # Balanced batch tiles; >=2 grid steps for medium/large B so v7x's two
    # TensorCores both get work via dimension_semantics=("parallel",).
    if B < 256:
        n_tiles, tile_b, b_pad = 1, B, B          # full-dim block, no padding
    else:
        n_tiles = max(pl.cdiv(B, MAX_TILE_B), 2)
        tile_b = _round_up(pl.cdiv(B, n_tiles), SUBLANE)
        b_pad = n_tiles * tile_b

    x = state.astype(jnp.float32)
    if b_pad != B:
        x = jnp.pad(x, ((0, b_pad - B), (0, 0)))  # <8 garbage rows per tile

    resident = lambda i: (0, 0)                   # weights stay in VMEM
    kernel = functools.partial(_actor_kernel, bf16_selu=_use_bf16_selu())

    out = pl.pallas_call(
        kernel,
        out_shape=jax.ShapeDtypeStruct((b_pad, num_actions), jnp.float32),
        grid=(n_tiles,),
        in_specs=[
            pl.BlockSpec((tile_b, num_state), lambda i: (i, 0)),   # x tile (f32, unpadded)
            pl.BlockSpec((num_state, NUM_HIDDEN), resident),       # w1
            pl.BlockSpec((1, NUM_HIDDEN), resident),               # b1
            pl.BlockSpec((NUM_HIDDEN, NUM_HIDDEN), resident),      # w2
            pl.BlockSpec((1, NUM_HIDDEN), resident),               # b2
            pl.BlockSpec((NUM_HIDDEN, NUM_HIDDEN), resident),      # w3
            pl.BlockSpec((1, NUM_HIDDEN), resident),               # b3
            pl.BlockSpec((NUM_HIDDEN, num_actions), resident),     # w4
            pl.BlockSpec((1, num_actions), resident),              # b4
        ],
        out_specs=pl.BlockSpec((tile_b, num_actions), lambda i: (i, 0)),
        compiler_params=pltpu.CompilerParams(
            dimension_semantics=("parallel",)),
    )(x,
      kparams["w1"], kparams["b1"],
      kparams["w2"], kparams["b2"],
      kparams["w3"], kparams["b3"],
      kparams["w4"], kparams["b4"])

    return out if b_pad == B else out[:B]


def actor_reference(state, params):
    """Pure-JAX f32 reference matching the PyTorch module."""
    if state.ndim == 1:
        state = state[None, :]
    h = state
    for i in range(1, 4):
        h = h @ params[f"w{i}"] + params[f"b{i}"]
        h = SELU_SCALE * jnp.where(h > 0, h, SELU_ALPHA * (jnp.exp(h) - 1.0))
    return h @ params["w4"] + params["b4"]


if __name__ == "__main__":
    key = jax.random.PRNGKey(0)
    k_param, k_state = jax.random.split(key)

    num_state = 32
    num_actions = 8
    batch = 2

    params = init_actor_params(k_param, num_state, num_actions)
    kparams = prepare_kernel_params(params)
    state = jax.random.normal(k_state, (batch, num_state), jnp.float32)

    out = actor_forward(state, kparams)
    out = jax.block_until_ready(out)

    ref = actor_reference(state, params)
    assert out.shape == (batch, num_actions)
    # bf16 MXU operands / bf16 SELU (f32 accumulation) -> loosened tolerance.
    assert jnp.allclose(out, ref, atol=5e-2, rtol=5e-2), "mismatch vs reference"

    print("KERNEL_OK")
</pallas_src>

<mosaic_0001>
module attributes {stable_mosaic.version = 11 : i64} {
  func.func @_actor_kernel(%arg0: i32, %arg1: memref<2x32xf32, #tpu.memory_space<vmem>>, %arg2: memref<32x256xbf16, #tpu.memory_space<vmem>>, %arg3: memref<1x256xf32, #tpu.memory_space<vmem>>, %arg4: memref<256x256xbf16, #tpu.memory_space<vmem>>, %arg5: memref<1x256xf32, #tpu.memory_space<vmem>>, %arg6: memref<256x256xbf16, #tpu.memory_space<vmem>>, %arg7: memref<1x256xf32, #tpu.memory_space<vmem>>, %arg8: memref<256x8xbf16, #tpu.memory_space<vmem>>, %arg9: memref<1x8xf32, #tpu.memory_space<vmem>>, %arg10: memref<2x8xf32, #tpu.memory_space<vmem>>) attributes {dimension_semantics = [#tpu.dimension_semantics<parallel>], iteration_bounds = array<i64: 1>, scalar_prefetch = 0 : i64, scratch_operands = 0 : i64, tpu.core_type = #tpu.core_type<tc>, window_params = [{transform_indices = @transform_0, window_bounds = array<i64: 2, 32>}, {pipeline_mode = #tpu.pipeline_mode<synchronous>, transform_indices = @transform_1, window_bounds = array<i64: 32, 256>}, {pipeline_mode = #tpu.pipeline_mode<synchronous>, transform_indices = @transform_2, window_bounds = array<i64: 1, 256>}, {pipeline_mode = #tpu.pipeline_mode<synchronous>, transform_indices = @transform_3, window_bounds = array<i64: 256, 256>}, {pipeline_mode = #tpu.pipeline_mode<synchronous>, transform_indices = @transform_4, window_bounds = array<i64: 1, 256>}, {pipeline_mode = #tpu.pipeline_mode<synchronous>, transform_indices = @transform_5, window_bounds = array<i64: 256, 256>}, {pipeline_mode = #tpu.pipeline_mode<synchronous>, transform_indices = @transform_6, window_bounds = array<i64: 1, 256>}, {pipeline_mode = #tpu.pipeline_mode<synchronous>, transform_indices = @transform_7, window_bounds = array<i64: 256, 8>}, {pipeline_mode = #tpu.pipeline_mode<synchronous>, transform_indices = @transform_8, window_bounds = array<i64: 1, 8>}, {transform_indices = @transform_9, window_bounds = array<i64: 2, 8>}]} {
    %c0 = arith.constant 0 : index
    %c0_0 = arith.constant 0 : index
    %0 = vector.load %arg1[%c0, %c0_0] : memref<2x32xf32, #tpu.memory_space<vmem>>, vector<2x32xf32>
    %1 = arith.truncf %0 : vector<2x32xf32> to vector<2x32xbf16>
    %c0_1 = arith.constant 0 : index
    %c0_2 = arith.constant 0 : index
    %2 = vector.load %arg2[%c0_1, %c0_2] : memref<32x256xbf16, #tpu.memory_space<vmem>>, vector<32x256xbf16>
    %cst = arith.constant dense<0.000000e+00> : vector<2x256xf32>
    %3 = tpu.matmul %1, %2, %cst {dimension_numbers = #tpu.dot_dimension_numbers<[1], [0], [0], [1], [0, 0, 1, 1], [], []>} : vector<2x32xbf16>, vector<32x256xbf16>, vector<2x256xf32> -> vector<2x256xf32>
    %c0_3 = arith.constant 0 : index
    %c0_4 = arith.constant 0 : index
    %4 = vector.load %arg3[%c0_3, %c0_4] : memref<1x256xf32, #tpu.memory_space<vmem>>, vector<1x256xf32>
    %5 = vector.broadcast %4 : vector<1x256xf32> to vector<2x256xf32>
    %6 = arith.addf %3, %5 : vector<2x256xf32>
    %7 = arith.truncf %6 : vector<2x256xf32> to vector<2x256xbf16>
    %cst_5 = arith.constant 0.000000e+00 : bf16
    %8 = vector.broadcast %cst_5 : bf16 to vector<2x256xbf16>
    %9 = arith.minimumf %7, %8 : vector<2x256xbf16>
    %10 = math.exp %9 : vector<2x256xbf16>
    %cst_6 = arith.constant 1.000000e+00 : bf16
    %11 = vector.broadcast %cst_6 : bf16 to vector<2x256xbf16>
    %12 = arith.subf %10, %11 : vector<2x256xbf16>
    %cst_7 = arith.constant 1.671880e+00 : bf16
    %13 = vector.broadcast %cst_7 : bf16 to vector<2x256xbf16>
    %14 = arith.mulf %13, %12 : vector<2x256xbf16>
    %cst_8 = arith.constant 0.000000e+00 : bf16
    %15 = vector.broadcast %cst_8 : bf16 to vector<2x256xbf16>
    %16 = arith.cmpf ogt, %7, %15 : vector<2x256xbf16>
    %17 = arith.select %16, %7, %14 : vector<2x256xi1>, vector<2x256xbf16>
    %c0_9 = arith.constant 0 : index
    %c0_10 = arith.constant 0 : index
    %18 = vector.load %arg4[%c0_9, %c0_10] : memref<256x256xbf16, #tpu.memory_space<vmem>>, vector<256x256xbf16>
    %cst_11 = arith.constant dense<0.000000e+00> : vector<2x256xf32>
    %19 = tpu.matmul %17, %18, %cst_11 {dimension_numbers = #tpu.dot_dimension_numbers<[1], [0], [0], [1], [0, 0, 1, 1], [], []>} : vector<2x256xbf16>, vector<256x256xbf16>, vector<2x256xf32> -> vector<2x256xf32>
    %c0_12 = arith.constant 0 : index
    %c0_13 = arith.constant 0 : index
    %20 = vector.load %arg5[%c0_12, %c0_13] : memref<1x256xf32, #tpu.memory_space<vmem>>, vector<1x256xf32>
    %21 = vector.broadcast %20 : vector<1x256xf32> to vector<2x256xf32>
    %22 = arith.addf %19, %21 : vector<2x256xf32>
    %23 = arith.truncf %22 : vector<2x256xf32> to vector<2x256xbf16>
    %cst_14 = arith.constant 0.000000e+00 : bf16
    %24 = vector.broadcast %cst_14 : bf16 to vector<2x256xbf16>
    %25 = arith.minimumf %23, %24 : vector<2x256xbf16>
    %26 = math.exp %25 : vector<2x256xbf16>
    %cst_15 = arith.constant 1.000000e+00 : bf16
    %27 = vector.broadcast %cst_15 : bf16 to vector<2x256xbf16>
    %28 = arith.subf %26, %27 : vector<2x256xbf16>
    %cst_16 = arith.constant 1.671880e+00 : bf16
    %29 = vector.broadcast %cst_16 : bf16 to vector<2x256xbf16>
    %30 = arith.mulf %29, %28 : vector<2x256xbf16>
    %cst_17 = arith.constant 0.000000e+00 : bf16
    %31 = vector.broadcast %cst_17 : bf16 to vector<2x256xbf16>
    %32 = arith.cmpf ogt, %23, %31 : vector<2x256xbf16>
    %33 = arith.select %32, %23, %30 : vector<2x256xi1>, vector<2x256xbf16>
    %c0_18 = arith.constant 0 : index
    %c0_19 = arith.constant 0 : index
    %34 = vector.load %arg6[%c0_18, %c0_19] : memref<256x256xbf16, #tpu.memory_space<vmem>>, vector<256x256xbf16>
    %cst_20 = arith.constant dense<0.000000e+00> : vector<2x256xf32>
    %35 = tpu.matmul %33, %34, %cst_20 {dimension_numbers = #tpu.dot_dimension_numbers<[1], [0], [0], [1], [0, 0, 1, 1], [], []>} : vector<2x256xbf16>, vector<256x256xbf16>, vector<2x256xf32> -> vector<2x256xf32>
    %c0_21 = arith.constant 0 : index
    %c0_22 = arith.constant 0 : index
    %36 = vector.load %arg7[%c0_21, %c0_22] : memref<1x256xf32, #tpu.memory_space<vmem>>, vector<1x256xf32>
    %37 = vector.broadcast %36 : vector<1x256xf32> to vector<2x256xf32>
    %38 = arith.addf %35, %37 : vector<2x256xf32>
    %39 = arith.truncf %38 : vector<2x256xf32> to vector<2x256xbf16>
    %cst_23 = arith.constant 0.000000e+00 : bf16
    %40 = vector.broadcast %cst_23 : bf16 to vector<2x256xbf16>
    %41 = arith.minimumf %39, %40 : vector<2x256xbf16>
    %42 = math.exp %41 : vector<2x256xbf16>
    %cst_24 = arith.constant 1.000000e+00 : bf16
    %43 = vector.broadcast %cst_24 : bf16 to vector<2x256xbf16>
    %44 = arith.subf %42, %43 : vector<2x256xbf16>
    %cst_25 = arith.constant 1.671880e+00 : bf16
    %45 = vector.broadcast %cst_25 : bf16 to vector<2x256xbf16>
    %46 = arith.mulf %45, %44 : vector<2x256xbf16>
    %cst_26 = arith.constant 0.000000e+00 : bf16
    %47 = vector.broadcast %cst_26 : bf16 to vector<2x256xbf16>
    %48 = arith.cmpf ogt, %39, %47 : vector<2x256xbf16>
    %49 = arith.select %48, %39, %46 : vector<2x256xi1>, vector<2x256xbf16>
    %c0_27 = arith.constant 0 : index
    %c0_28 = arith.constant 0 : index
    %50 = vector.load %arg8[%c0_27, %c0_28] : memref<256x8xbf16, #tpu.memory_space<vmem>>, vector<256x8xbf16>
    %cst_29 = arith.constant dense<0.000000e+00> : vector<2x8xf32>
    %51 = tpu.matmul %49, %50, %cst_29 {dimension_numbers = #tpu.dot_dimension_numbers<[1], [0], [0], [1], [0, 0, 1, 1], [], []>} : vector<2x256xbf16>, vector<256x8xbf16>, vector<2x8xf32> -> vector<2x8xf32>
    %c0_30 = arith.constant 0 : index
    %c0_31 = arith.constant 0 : index
    %52 = vector.load %arg9[%c0_30, %c0_31] : memref<1x8xf32, #tpu.memory_space<vmem>>, vector<1x8xf32>
    %53 = vector.broadcast %52 : vector<1x8xf32> to vector<2x8xf32>
    %54 = arith.addf %51, %53 : vector<2x8xf32>
    %c0_32 = arith.constant 0 : index
    %c0_33 = arith.constant 0 : index
    %55 = vector.load %arg10[%c0_32, %c0_33] : memref<2x8xf32, #tpu.memory_space<vmem>>, vector<2x8xf32>
    tpu.vector_store %arg10[%c0_32, %c0_33], %54 {strides = array<i32>} : memref<2x8xf32, #tpu.memory_space<vmem>>, vector<2x8xf32>,
    return
  }
  func.func @transform_0(%arg0: i32) -> (i32, i32) {
    %c0_i32 = arith.constant 0 : i32
    %c0_i32_0 = arith.constant 0 : i32
    return %arg0, %c0_i32 : i32, i32
  }
  func.func @transform_1(%arg0: i32) -> (i32, i32) {
    %c0_i32 = arith.constant 0 : i32
    %c0_i32_0 = arith.constant 0 : i32
    %c0_i32_1 = arith.constant 0 : i32
    return %c0_i32, %c0_i32_0 : i32, i32
  }
  func.func @transform_2(%arg0: i32) -> (i32, i32) {
    %c0_i32 = arith.constant 0 : i32
    %c0_i32_0 = arith.constant 0 : i32
    %c0_i32_1 = arith.constant 0 : i32
    return %c0_i32, %c0_i32_0 : i32, i32
  }
  func.func @transform_3(%arg0: i32) -> (i32, i32) {
    %c0_i32 = arith.constant 0 : i32
    %c0_i32_0 = arith.constant 0 : i32
    %c0_i32_1 = arith.constant 0 : i32
    return %c0_i32, %c0_i32_0 : i32, i32
  }
  func.func @transform_4(%arg0: i32) -> (i32, i32) {
    %c0_i32 = arith.constant 0 : i32
    %c0_i32_0 = arith.constant 0 : i32
    %c0_i32_1 = arith.constant 0 : i32
    return %c0_i32, %c0_i32_0 : i32, i32
  }
  func.func @transform_5(%arg0: i32) -> (i32, i32) {
    %c0_i32 = arith.constant 0 : i32
    %c0_i32_0 = arith.constant 0 : i32
    %c0_i32_1 = arith.constant 0 : i32
    return %c0_i32, %c0_i32_0 : i32, i32
  }
  func.func @transform_6(%arg0: i32) -> (i32, i32) {
    %c0_i32 = arith.constant 0 : i32
    %c0_i32_0 = arith.constant 0 : i32
    %c0_i32_1 = arith.constant 0 : i32
    return %c0_i32, %c0_i32_0 : i32, i32
  }
  func.func @transform_7(%arg0: i32) -> (i32, i32) {
    %c0_i32 = arith.constant 0 : i32
    %c0_i32_0 = arith.constant 0 : i32
    %c0_i32_1 = arith.constant 0 : i32
    return %c0_i32, %c0_i32_0 : i32, i32
  }
  func.func @transform_8(%arg0: i32) -> (i32, i32) {
    %c0_i32 = arith.constant 0 : i32
    %c0_i32_0 = arith.constant 0 : i32
    %c0_i32_1 = arith.constant 0 : i32
    return %c0_i32, %c0_i32_0 : i32, i32
  }
  func.func @transform_9(%arg0: i32) -> (i32, i32) {
    %c0_i32 = arith.constant 0 : i32
    %c0_i32_0 = arith.constant 0 : i32
    return %arg0, %c0_i32 : i32, i32
  }
}

</mosaic_0001>

<bundles_post_ra>
// kernel: tpu_custom_call.1
= control target key start
LH: loop header
LB: loop body
LE: loop exit
PB: predicated region body
PF: predicated region fallthrough
CT: control target
= control target key end

     0   :  { %14 = vsyncpa [#allocation3], 0  ;;  %s1589_s0 = inlined_call_operand.vmem [shape: f32[2,32], index: 0, kind: input, shape index: {}]   ;;  %s1590_s1 = inlined_call_operand.vmem [shape: bf16[32,256], index: 1, kind: input, shape index: {}]   ;;  %s1591_s2 = inlined_call_operand.vmem [shape: f32[1,256], index: 2, kind: input, shape index: {}]   ;;  %s1592_s3 = inlined_call_operand.hbm [shape: bf16[256,256], index: 3, kind: input, shape index: {}]   ;;  %s1593_s4 = inlined_call_operand.vmem [shape: f32[1,256], index: 4, kind: input, shape index: {}]   ;;  %s1594_s5 = inlined_call_operand.hbm [shape: bf16[256,256], index: 5, kind: input, shape index: {}]   ;;  %s1595_s6 = inlined_call_operand.vmem [shape: f32[1,256], index: 6, kind: input, shape index: {}]   ;;  %s1596_s7 = inlined_call_operand.vmem [shape: bf16[256,8], index: 7, kind: input, shape index: {}]   ;;  %s1597_s8 = inlined_call_operand.vmem [shape: f32[1,8], index: 8, kind: input, shape index: {}]   ;;  %s1598_s9 = inlined_call_operand.hbm [shape: f32[2,8], index: 9, kind: output, shape index: {}]  }
   0x1   :  { %15 = vsyncpa [#allocation6], 0 }
   0x2   :  { %16 = vsyncpa [#allocation4], 0  ;;  %s27_s11 = sshll.u32 %s1592_s3, 4  ;;  %s1432_s12 = smov [#allocation2]   ;;  %s28_s11 = int_to_ptr.hbm [resolvable:$true] %s27_s11 }
   0x3   :  { %s29_s13 = sshll.u32 %s1432_s12, 4  ;;  %s42_s16 = sshll.u32 %s1594_s5, 4  ;;  %s30_s13 = int_to_ptr.vmem [resolvable:$true] %s29_s13  ;;  %s43_s16 = int_to_ptr.hbm [resolvable:$true] %s42_s16 }
   0x4   :  { %s1433_s17 = smov 128   ;;  %s1434_s18 = smov 8  }
   0x5   :  { %35 = dma.hbm_to_vmem [thread:$0]  %s28_s11, 4096, %s30_s13, [#allocation3], %s1433_s17, %s1433_s17, %s1434_s18  }
   0x6   :  { %s1435_s19 = smov [#allocation5]  }
   0x7   :  { %s44_s20 = sshll.u32 %s1435_s19, 4  ;;  %s45_s20 = int_to_ptr.vmem [resolvable:$true] %s44_s20 }
   0x8   :  { %50 = dma.hbm_to_vmem [thread:$0]  %s43_s16, 4096, %s45_s20, [#allocation6], %s1433_s17, %s1433_s17, %s1434_s18  }
   0x9   :  { %1426 = dma.done.wait [#allocation3], 4096  }
   0xa   :  { %1427 = vsyncadd [#allocation3], 4294963200 }
   0xb   :  { %1428 = dma.done.wait [#allocation6], 4096  }
   0xc   :  { %1429 = vsyncadd [#allocation6], 4294963200  ;;  %v918_v0 = vld [vmem:[%s1590_s1 + $0x10] sm:$0xf]  ;;  %v1255_v1 = vld [vmem:[%s1590_s1 + $0x14] sm:$0xf0] }
   0xd   :  { %v1254_v2 = vld [vmem:[%s1590_s1 + $0x14] sm:$0xf]  ;;  %v919_v3 = vor.u32 %v1255_v1, %v918_v0  ;;  %v920_v4 = vld [vmem:[%s1590_s1 + $0x18] sm:$0xf0]  ;;  %v910_v5 = vld [vmem:[%s1590_s1] sm:$0xf] }
   0xe   :  { %v1253_v6 = vld [vmem:[%s1590_s1 + $0x4] sm:$0xf0]  ;;  %v923_v7 = vor.u32 %v1254_v2, %v920_v4  ;;  %v1252_v8 = vld [vmem:[%s1590_s1 + $0x4] sm:$0xf]  ;;  %v912_v9 = vld [vmem:[%s1590_s1 + $0x8] sm:$0xf0] }
   0xf   :  { %108 = vmatpush.bf16.msra.mxu0 %v919_v3  ;;  %v911_v10 = vor.u32 %v1253_v6, %v910_v5  ;;  %v66_v11 = vld [vmem:[%s1589_s0] sm:$0x3]  ;;  %v915_v12 = vor.u32 %v1252_v8, %v912_v9  ;;  %vm98_vm0 = vcmask 261120   ;;  %v986_v14 = vld [vmem:[#allocation2 + $0x70] sm:$0xf]  ;;  %s1436_s22 = smov [#allocation7]  }
  0x10   :  { %121 = vmatpush.bf16.msra.mxu1 %v923_v7  ;;  %v67_v13 = vpack.c.bf16 %v66_v11, %v66_v11  ;;  %v1271_v15 = vld [vmem:[#allocation2 + $0x74] sm:$0xf0]  ;;  %v1050_v16 = vld [vmem:[#allocation2 + $0xf0] sm:$0xf]  ;;  %v1270_v19 = vld [vmem:[#allocation2 + $0x74] sm:$0xf] }
  0x11   :  { %v987_v17 = vor.u32 %v1271_v15, %v986_v14  ;;  %v1287_v18 = vld [vmem:[#allocation2 + $0xf4] sm:$0xf0]  ;;  %v988_v20 = vld [vmem:[#allocation2 + $0x78] sm:$0xf0]  ;;  %v1286_v23 = vld [vmem:[#allocation2 + $0xf4] sm:$0xf] }
  0x12   :  { %v1051_v21 = vor.u32 %v1287_v18, %v1050_v16  ;;  %v991_v22 = vor.u32 %v1270_v19, %v988_v20  ;;  %v1052_v24 = vld [vmem:[#allocation2 + $0xf8] sm:$0xf0]  ;;  %v978_v26 = vld [vmem:[#allocation2 + $0x60] sm:$0xf]  ;;  %v1269_v27 = vld [vmem:[#allocation2 + $0x64] sm:$0xf0] }
  0x13   :  { %109 = vmatpush.bf16.msra.mxu0 %v911_v10  ;;  %360 = vmatpush.bf16.msra.mxu2 %v987_v17  ;;  %v1055_v25 = vor.u32 %v1286_v23, %v1052_v24  ;;  %v1042_v28 = vld [vmem:[#allocation2 + $0xe0] sm:$0xf]  ;;  %v979_v29 = vor.u32 %v1269_v27, %v978_v26  ;;  %v1285_v30 = vld [vmem:[#allocation2 + $0xe4] sm:$0xf0]  ;;  %v1268_v31 = vld [vmem:[#allocation2 + $0x64] sm:$0xf] }
  0x14   :  { %122 = vmatpush.bf16.msra.mxu1 %v915_v12  ;;  %373 = vmatpush.bf16.msra.mxu3 %v1051_v21  ;;  %v980_v32 = vld [vmem:[#allocation2 + $0x68] sm:$0xf0]  ;;  %v1043_v33 = vor.u32 %v1285_v30, %v1042_v28  ;;  %v1284_v35 = vld [vmem:[#allocation2 + $0xe4] sm:$0xf]  ;;  %v970_v38 = vld [vmem:[#allocation2 + $0x50] sm:$0xf] }
  0x15   :  { %v983_v34 = vor.u32 %v1268_v31, %v980_v32  ;;  %v1044_v36 = vld [vmem:[#allocation2 + $0xe8] sm:$0xf0]  ;;  %v1267_v39 = vld [vmem:[#allocation2 + $0x54] sm:$0xf0]  ;;  %v1034_v40 = vld [vmem:[#allocation2 + $0xd0] sm:$0xf] }
  0x16   :  { %924 = vmatmul.msk.bf16.vlgmr.msra.gmra.mxu0 %vm98_vm0, %v67_v13  ;;  %v1047_v37 = vor.u32 %v1284_v35, %v1044_v36  ;;  %v971_v41 = vor.u32 %v1267_v39, %v970_v38  ;;  %v1283_v42 = vld [vmem:[#allocation2 + $0xd4] sm:$0xf0]  ;;  %v1266_v43 = vld [vmem:[#allocation2 + $0x54] sm:$0xf]  ;;  %v972_v44 = vld [vmem:[#allocation2 + $0x58] sm:$0xf0] }
  0x17   :  { %925 = vmatmul.msk.bf16.vlgmr.msra.gmra.mxu1 %vm98_vm0, %v67_v13  ;;  %386 = vmatpush.bf16.msrb.mxu0 %v991_v22  ;;  %v1035_v45 = vor.u32 %v1283_v42, %v1034_v40  ;;  %v975_v46 = vor.u32 %v1266_v43, %v972_v44  ;;  %v1282_v47 = vld [vmem:[#allocation2 + $0xd4] sm:$0xf]  ;;  %v1036_v48 = vld [vmem:[#allocation2 + $0xd8] sm:$0xf0]  ;;  %v962_v49 = vld [vmem:[#allocation2 + $0x40] sm:$0xf] }
  0x18   :  { %399 = vmatpush.bf16.msrb.mxu1 %v1055_v25  ;;  %361 = vmatpush.bf16.msra.mxu2 %v979_v29  ;;  %v1039_v50 = vor.u32 %v1282_v47, %v1036_v48  ;;  %v1265_v51 = vld [vmem:[#allocation2 + $0x44] sm:$0xf0]  ;;  %v1026_v52 = vld [vmem:[#allocation2 + $0xc0] sm:$0xf]  ;;  %v1264_v56 = vld [vmem:[#allocation2 + $0x44] sm:$0xf] }
  0x19   :  { %374 = vmatpush.bf16.msra.mxu3 %v1043_v33  ;;  %v1281_v53 = vld [vmem:[#allocation2 + $0xc4] sm:$0xf0]  ;;  %v963_v54 = vor.u32 %v1265_v51, %v962_v49  ;;  %v964_v57 = vld [vmem:[#allocation2 + $0x48] sm:$0xf0]  ;;  %v1280_v58 = vld [vmem:[#allocation2 + $0xc4] sm:$0xf] }
  0x1a   :  { %v1027_v55 = vor.u32 %v1281_v53, %v1026_v52  ;;  %v967_v59 = vor.u32 %v1264_v56, %v964_v57  ;;  %v1028_v60 = vld [vmem:[#allocation2 + $0xc8] sm:$0xf0]  ;;  %v954_v61 = vld [vmem:[#allocation2 + $0x30] sm:$0xf]  ;;  %v1263_v62 = vld [vmem:[#allocation2 + $0x34] sm:$0xf0] }
  0x1b   :  { %387 = vmatpush.bf16.msrb.mxu0 %v983_v34  ;;  %v72_v63 = vld [vmem:[%s1591_s2] sm:$0x3]  ;;  %v1031_v0 = vor.u32 %v1280_v58, %v1028_v60  ;;  %v1018_v1 = vld [vmem:[#allocation2 + $0xb0] sm:$0xf]  ;;  %v1279_v2 = vld [vmem:[#allocation2 + $0xb4] sm:$0xf0]  ;;  %v955_v4 = vor.u32 %v1263_v62, %v954_v61 }
  0x1c   :  { %400 = vmatpush.bf16.msrb.mxu1 %v1047_v37  ;;  %362 = vmatpush.bf16.msra.mxu2 %v971_v41  ;;  %v1262_v3 = vld [vmem:[#allocation2 + $0x34] sm:$0xf]  ;;  %v956_v5 = vld [vmem:[#allocation2 + $0x38] sm:$0xf0]  ;;  %v1019_v8 = vor.u32 %v1279_v2, %v1018_v1  ;;  %v946_v10 = vld [vmem:[#allocation2 + $0x20] sm:$0xf] }
  0x1d   :  { %375 = vmatpush.bf16.msra.mxu3 %v1035_v45  ;;  %v1278_v6 = vld [vmem:[#allocation2 + $0xb4] sm:$0xf]  ;;  %v1020_v7 = vld [vmem:[#allocation2 + $0xb8] sm:$0xf0]  ;;  %v959_v9 = vor.u32 %v1262_v3, %v956_v5  ;;  %v1261_v11 = vld [vmem:[#allocation2 + $0x24] sm:$0xf0] }
  0x1e   :  { %v1010_v12 = vld [vmem:[#allocation2 + $0xa0] sm:$0xf]  ;;  %v1023_v13 = vor.u32 %v1278_v6, %v1020_v7  ;;  %v1277_v14 = vld [vmem:[#allocation2 + $0xa4] sm:$0xf0]  ;;  %v1260_v15 = vld [vmem:[#allocation2 + $0x24] sm:$0xf]  ;;  %v947_v21 = vor.u32 %v1261_v11, %v946_v10 }
  0x1f   :  { %388 = vmatpush.bf16.msrb.mxu0 %v975_v46  ;;  %v948_v16 = vld [vmem:[#allocation2 + $0x28] sm:$0xf0]  ;;  %v1276_v17 = vld [vmem:[#allocation2 + $0xa4] sm:$0xf]  ;;  %v74_v19 = vperm.slane %v72_v63, 0  ;;  %v75_v20 = vperm.slane %v72_v63, 1  ;;  %v1011_v22 = vor.u32 %v1277_v14, %v1010_v12 }
  0x20   :  { %401 = vmatpush.bf16.msrb.mxu1 %v1039_v50  ;;  %363 = vmatpush.bf16.msra.mxu2 %v963_v54  ;;  %v1012_v18 = vld [vmem:[#allocation2 + $0xa8] sm:$0xf0]  ;;  %v951_v23 = vor.u32 %v1260_v15, %v948_v16  ;;  %v938_v24 = vld [vmem:[#allocation2 + $0x10] sm:$0xf]  ;;  %v1259_v25 = vld [vmem:[#allocation2 + $0x14] sm:$0xf0] }
  0x21   :  { %376 = vmatpush.bf16.msra.mxu3 %v1027_v55  ;;  %v1002_v26 = vld [vmem:[#allocation2 + $0x90] sm:$0xf]  ;;  %v1015_v27 = vor.u32 %v1276_v17, %v1012_v18  ;;  %v1275_v28 = vld [vmem:[#allocation2 + $0x94] sm:$0xf0]  ;;  %v1258_v29 = vld [vmem:[#allocation2 + $0x14] sm:$0xf]  ;;  %v939_v34 = vor.u32 %v1259_v25, %v938_v24 }
  0x22   :  { %v940_v30 = vld [vmem:[#allocation2 + $0x18] sm:$0xf0]  ;;  %v1274_v31 = vld [vmem:[#allocation2 + $0x94] sm:$0xf]  ;;  %v1003_v37 = vor.u32 %v1275_v28, %v1002_v26  ;;  %v930_v39 = vld [vmem:[#allocation2] sm:$0xf] }
  0x23   :  { %389 = vmatpush.bf16.msrb.mxu0 %v967_v59  ;;  %v1004_v32 = vld [vmem:[#allocation2 + $0x98] sm:$0xf0]  ;;  %v943_v38 = vor.u32 %v1258_v29, %v940_v30  ;;  %v1257_v40 = vld [vmem:[#allocation2 + $0x4] sm:$0xf0]  ;;  %v994_v41 = vld [vmem:[#allocation2 + $0x80] sm:$0xf] }
  0x24   :  { %402 = vmatpush.bf16.msrb.mxu1 %v1031_v0  ;;  %364 = vmatpush.bf16.msra.mxu2 %v955_v4  ;;  %v1007_v43 = vor.u32 %v1274_v31, %v1004_v32  ;;  %v1273_v44 = vld [vmem:[#allocation2 + $0x84] sm:$0xf0]  ;;  %v1256_v45 = vld [vmem:[#allocation2 + $0x4] sm:$0xf]  ;;  %v932_v46 = vld [vmem:[#allocation2 + $0x8] sm:$0xf0]  ;;  %v931_v50 = vor.u32 %v1257_v40, %v930_v39 }
  0x25   :  { %377 = vmatpush.bf16.msra.mxu3 %v1019_v8  ;;  %v1272_v47 = vld [vmem:[#allocation2 + $0x84] sm:$0xf]  ;;  %v996_v48 = vld [vmem:[#allocation2 + $0x88] sm:$0xf0]  ;;  %v995_v51 = vor.u32 %v1273_v44, %v994_v41  ;;  %v935_v52 = vor.u32 %v1256_v45, %v932_v46  ;;  %v1302_v24 = vld [vmem:[#allocation5 + $0x74] sm:$0xf] }
  0x26   :  { %v999_v55 = vor.u32 %v1272_v47, %v996_v48  ;;  %v1118_v25 = vld [vmem:[#allocation5 + $0x78] sm:$0xf0]  ;;  %v1318_v28 = vld [vmem:[#allocation5 + $0xf4] sm:$0xf]  ;;  %v1526_v30 = vld [vmem:[%s1593_s4] sm:$0x3] }
  0x27   :  { %390 = vmatpush.bf16.msrb.mxu0 %v959_v9  ;;  %v1182_v29 = vld [vmem:[#allocation5 + $0xf8] sm:$0xf0]  ;;  %v1108_v32 = vld [vmem:[#allocation5 + $0x60] sm:$0xf]  ;;  %v1316_v41 = vld [vmem:[#allocation5 + $0xe4] sm:$0xf] }
  0x28   :  { %403 = vmatpush.bf16.msrb.mxu1 %v1023_v13  ;;  %365 = vmatpush.bf16.msra.mxu2 %v947_v21  ;;  %v1180_v21 = vld [vmem:[#allocation5 + $0xf0] sm:$0xf]  ;;  %v1185_v31 = vor.u32 %v1318_v28, %v1182_v29  ;;  %v1299_v46 = vld [vmem:[#allocation5 + $0x54] sm:$0xf0]  ;;  %s895_s23 = sshll.u32 %s1436_s22, 4  ;;  %s897_s25 = sshll.u32 %s1598_s9, 4  ;;  %s896_s23 = int_to_ptr.vmem [resolvable:$true] %s895_s23  ;;  %s898_s25 = int_to_ptr.hbm [resolvable:$true] %s897_s25 }
  0x29   :  { %378 = vmatpush.bf16.msra.mxu3 %v1011_v22  ;;  %v1100_v45 = vld [vmem:[#allocation5 + $0x50] sm:$0xf]  ;;  %vm888_vm10 = vcmask 58368  }
  0x2a   :  { %v1164_v47 = vld [vmem:[#allocation5 + $0xd0] sm:$0xf]  ;;  %v1101_v48 = vor.u32 %v1299_v46, %v1100_v45 }
  0x2b   :  { %391 = vmatpush.bf16.msrb.mxu0 %v951_v23  ;;  %v1319_v23 = vld [vmem:[#allocation5 + $0xf4] sm:$0xf0] }
  0x2c   :  { %404 = vmatpush.bf16.msrb.mxu1 %v1015_v27  ;;  %366 = vmatpush.bf16.msra.mxu2 %v939_v34  ;;  %v1181_v26 = vor.u32 %v1319_v23, %v1180_v21  ;;  %v1121_v27 = vor.u32 %v1302_v24, %v1118_v25  ;;  %v1172_v34 = vld [vmem:[#allocation5 + $0xe0] sm:$0xf]  ;;  %v1292_v23 = vld [vmem:[#allocation5 + $0x24] sm:$0xf]  ;;  %v1078_v24 = vld [vmem:[#allocation5 + $0x28] sm:$0xf0] }
  0x2d   :  { %379 = vmatpush.bf16.msra.mxu3 %v1003_v37  ;;  %v1300_v37 = vld [vmem:[#allocation5 + $0x64] sm:$0xf] }
  0x2e   :  { %v1308_v25 = vld [vmem:[#allocation5 + $0xa4] sm:$0xf] }
  0x2f   :  { %392 = vmatpush.bf16.msrb.mxu0 %v943_v38  ;;  %v1110_v38 = vld [vmem:[#allocation5 + $0x68] sm:$0xf0] }
  0x30   :  { %405 = vmatpush.bf16.msrb.mxu1 %v1007_v43  ;;  %367 = vmatpush.bf16.msra.mxu2 %v931_v50  ;;  %v1113_v40 = vor.u32 %v1300_v37, %v1110_v38  ;;  %v190_v43 = vperm.slane %v1526_v30, 1  ;;  %v1298_v50 = vld [vmem:[#allocation5 + $0x54] sm:$0xf]  ;;  %v1307_v37 = vld [vmem:[#allocation5 + $0x94] sm:$0xf0] }
  0x31   :  { %380 = vmatpush.bf16.msra.mxu3 %v995_v51  ;;  %v1102_v51 = vld [vmem:[#allocation5 + $0x58] sm:$0xf0]  ;;  %v1290_v38 = vld [vmem:[#allocation5 + $0x14] sm:$0xf] }
  0x33   :  { %393 = vmatpush.bf16.msrb.mxu0 %v935_v52 }
  0x34   :  { %406 = vmatpush.bf16.msrb.mxu1 %v999_v55  ;;  %v1166_v55 = vld [vmem:[#allocation5 + $0xd8] sm:$0xf0] }
  0x35   :  { %657 = vmatpush.bf16.msrb.mxu3 %v1181_v26  ;;  %v1142_v26 = vld [vmem:[#allocation5 + $0xa8] sm:$0xf0] }
  0x37   :  { %670 = vmatpush.bf16.msra.mxu0 %v1121_v27  ;;  %v189_v27 = vperm.slane %v1526_v30, 0  ;;  %v1124_v30 = vld [vmem:[#allocation5 + $0x80] sm:$0xf] }
  0x38   :  { %683 = vmatpush.bf16.msra.mxu1 %v1185_v31  ;;  %v1081_v31 = vor.u32 %v1292_v23, %v1078_v24 }
  0x3b   :  { %671 = vmatpush.bf16.msra.mxu0 %v1113_v40 }
  0x93   :  { %v111_v33 = vpop.f32.mrf.mxu0 }
  0x94   :  { %v112_v35 = vadd.f32 %v111_v33, %v74_v19  ;;  %v124_v36 = vpop.f32.mrf.mxu1  ;;  %v1116_v19 = vld [vmem:[#allocation5 + $0x70] sm:$0xf]  ;;  %v1301_v33 = vld [vmem:[#allocation5 + $0x64] sm:$0xf0] }
  0x95   :  { %v125_v42 = vadd.f32 %v124_v36, %v75_v20  ;;  %v1303_v20 = vld [vmem:[#allocation5 + $0x74] sm:$0xf0]  ;;  %v1317_v36 = vld [vmem:[#allocation5 + $0xe4] sm:$0xf0] }
  0x96   :  { %v1117_v22 = vor.u32 %v1303_v20, %v1116_v19  ;;  %v1173_v39 = vor.u32 %v1317_v36, %v1172_v34  ;;  %v1132_v34 = vld [vmem:[#allocation5 + $0x90] sm:$0xf]  ;;  %v1145_v36 = vor.u32 %v1308_v25, %v1142_v26 }
  0x97   :  { %v128_v49 = vpack.c.bf16 %v125_v42, %v112_v35  ;;  %v1109_v35 = vor.u32 %v1301_v33, %v1108_v32  ;;  %v1174_v42 = vld [vmem:[#allocation5 + $0xe8] sm:$0xf0]  ;;  %v1068_v32 = vld [vmem:[#allocation5 + $0x10] sm:$0xf]  ;;  %v1291_v33 = vld [vmem:[#allocation5 + $0x14] sm:$0xf0] }
  0x98   :  { %644 = vmatpush.bf16.msrb.mxu2 %v1117_v22  ;;  %v1177_v44 = vor.u32 %v1316_v41, %v1174_v42  ;;  %658 = vmatpush.bf16.msrb.mxu3 %v1173_v39  ;;  %v1309_v22 = vld [vmem:[#allocation5 + $0xa4] sm:$0xf0]  ;;  %v1070_v39 = vld [vmem:[#allocation5 + $0x18] sm:$0xf0]  ;;  %v1306_v42 = vld [vmem:[#allocation5 + $0x94] sm:$0xf]  ;;  %v1069_v46 = vor.u32 %v1291_v33, %v1068_v32 }
  0x99   :  { %v129_v53 = vunpack.c.l.bf16 %v128_v49  ;;  %v130_v54 = vunpack.c.h.bf16 %v128_v49  ;;  %v1335_v32 = vld [vmem:[%s1596_s7 + $0x78] sm:$0xff]  ;;  %v1326_v33 = vld [vmem:[%s1596_s7 + $0x30] sm:$0xff] }
  0x9a   :  { %684 = vmatpush.bf16.msra.mxu1 %v1177_v44  ;;  %v1134_v44 = vld [vmem:[#allocation5 + $0x98] sm:$0xf0] }
  0x9b   :  { %v131_v56 = vmin.f32 %v129_v53, 0.0  ;;  %v132_v57 = vmin.f32 %v130_v54, 0.0  ;;  %v113_v58 = vpop.f32.mrf.mxu0  ;;  %vm151_vm1 = vcmp.gt.f32.partialorder %v129_v53, 0.0  ;;  %vm152_vm2 = vcmp.gt.f32.partialorder %v130_v54, 0.0  ;;  %v1314_v54 = vld [vmem:[#allocation5 + $0xd4] sm:$0xf] }
  0x9c   :  { %v126_v59 = vpop.f32.mrf.mxu1  ;;  %vm153_vm3 = vmpackc.low %vm152_vm2, %vm151_vm1  ;;  %645 = vmatpush.bf16.msrb.mxu2 %v1109_v35  ;;  %v1105_v53 = vor.u32 %v1298_v50, %v1102_v51  ;;  %v1297_v58 = vld [vmem:[#allocation5 + $0x44] sm:$0xf0] }
  0x9d   :  { %v133_v60 = vpack.c.bf16 %v132_v57, %v131_v56  ;;  %v1092_v56 = vld [vmem:[#allocation5 + $0x40] sm:$0xf]  ;;  %v1169_v57 = vor.u32 %v1314_v54, %v1166_v55  ;;  %v1289_v50 = vld [vmem:[#allocation5 + $0x4] sm:$0xf0]  ;;  %v1137_v54 = vor.u32 %v1306_v42, %v1134_v44  ;;  %v1323_v44 = vld [vmem:[%s1596_s7 + $0x18] sm:$0xff] }
  0x9e   :  { %v1156_v59 = vld [vmem:[#allocation5 + $0xc0] sm:$0xf]  ;;  %672 = vmatpush.bf16.msra.mxu0 %v1105_v53  ;;  %v1305_v55 = vld [vmem:[#allocation5 + $0x84] sm:$0xf0] }
  0x9f   :  { %v134_v61 = vunpack.c.l.bf16 %v133_v60  ;;  %v135_v62 = vunpack.c.h.bf16 %v133_v60  ;;  %v1313_v60 = vld [vmem:[#allocation5 + $0xc4] sm:$0xf0]  ;;  %685 = vmatpush.bf16.msra.mxu1 %v1169_v57  ;;  %v1062_v57 = vld [vmem:[#allocation5 + $0x8] sm:$0xf0] }
  0xa0   :  { %646 = vmatpush.bf16.msrb.mxu2 %v1101_v48  ;;  %v1073_v48 = vor.u32 %v1290_v38, %v1070_v39  ;;  %v1332_v38 = vld [vmem:[%s1596_s7 + $0x60] sm:$0xff] }
  0xa1   :  { %v136_v63 = vmul.f32 1.442695, %v134_v61  ;;  %v138_v0 = vmul.f32 1.442695, %v135_v62  ;;  %v1093_v61 = vor.u32 %v1297_v58, %v1092_v56  ;;  %v1157_v62 = vor.u32 %v1313_v60, %v1156_v59  ;;  %v1288_v56 = vld [vmem:[#allocation5 + $0x4] sm:$0xf] }
  0xa2   :  { %v1304_v58 = vld [vmem:[#allocation5 + $0x84] sm:$0xf]  ;;  %v1126_v59 = vld [vmem:[#allocation5 + $0x88] sm:$0xf0]  ;;  %v471_v39 = vld [vmem:[%s1595_s6] sm:$0x3] }
  0xa3   :  { %1342 = vpow2.f32 %v136_v63  ;;  %v1296_v63 = vld [vmem:[#allocation5 + $0x44] sm:$0xf] }
  0xa4   :  { %1344 = vpow2.f32 %v138_v0  ;;  %v1094_v0 = vld [vmem:[#allocation5 + $0x48] sm:$0xf0]  ;;  %647 = vmatpush.bf16.msrb.mxu2 %v1093_v61 }
  0xa9   :  { %v1343_v1 = vpop.eup %1342 }
  0xaa   :  { %v1345_v2 = vpop.eup %1344 }
  0xab   :  { %v140_v3 = vpack.c.bf16 %v1345_v2, %v1343_v1  ;;  %v1312_v1 = vld [vmem:[#allocation5 + $0xc4] sm:$0xf]  ;;  %v1097_v2 = vor.u32 %v1296_v63, %v1094_v0  ;;  %v1065_v63 = vor.u32 %v1288_v56, %v1062_v57  ;;  %v1329_v56 = vld [vmem:[%s1596_s7 + $0x48] sm:$0xff] }
  0xad   :  { %v141_v4 = vunpack.c.l.bf16 %v140_v3  ;;  %v142_v5 = vunpack.c.h.bf16 %v140_v3  ;;  %v1158_v3 = vld [vmem:[#allocation5 + $0xc8] sm:$0xf0]  ;;  %673 = vmatpush.bf16.msra.mxu0 %v1097_v2  ;;  %v1129_v2 = vor.u32 %v1304_v58, %v1126_v59 }
  0xaf   :  { %v926_v6 = vadd.f32 -1.0, %v141_v4  ;;  %v927_v7 = vadd.f32 -1.0, %v142_v5  ;;  %v1084_v4 = vld [vmem:[#allocation5 + $0x30] sm:$0xf]  ;;  %v1295_v5 = vld [vmem:[#allocation5 + $0x34] sm:$0xf0] }
  0xb1   :  { %v145_v8 = vpack.c.bf16 %v927_v7, %v926_v6  ;;  %v1161_v6 = vor.u32 %v1312_v1, %v1158_v3  ;;  %v1148_v7 = vld [vmem:[#allocation5 + $0xb0] sm:$0xf] }
  0xb3   :  { %v146_v9 = vunpack.c.l.bf16 %v145_v8  ;;  %v147_v10 = vunpack.c.h.bf16 %v145_v8  ;;  %v1311_v8 = vld [vmem:[#allocation5 + $0xb4] sm:$0xf0]  ;;  %686 = vmatpush.bf16.msra.mxu1 %v1161_v6 }
  0xb5   :  { %v148_v11 = vmul.f32 1.671875, %v146_v9  ;;  %v149_v12 = vmul.f32 1.671875, %v147_v10  ;;  %v1294_v9 = vld [vmem:[#allocation5 + $0x34] sm:$0xf]  ;;  %v1085_v10 = vor.u32 %v1295_v5, %v1084_v4 }
  0xb7   :  { %v150_v13 = vpack.c.bf16 %v149_v12, %v148_v11  ;;  %v1086_v11 = vld [vmem:[#allocation5 + $0x38] sm:$0xf0]  ;;  %v1310_v12 = vld [vmem:[#allocation5 + $0xb4] sm:$0xf]  ;;  %648 = vmatpush.bf16.msrb.mxu2 %v1085_v10 }
  0xb9   :  { %v154_v14 = vsel %vm153_vm3, %v128_v49, %v150_v13  ;;  %v1315_v49 = vld [vmem:[#allocation5 + $0xd4] sm:$0xf0]  ;;  %v1150_v13 = vld [vmem:[#allocation5 + $0xb8] sm:$0xf0] }
  0xba   :  { %v194_v15 = vunpack.c.l.b16 %v154_v14  ;;  %v195_v16 = vunpack.c.h.b16 %v154_v14  ;;  %v1165_v52 = vor.u32 %v1315_v49, %v1164_v47  ;;  %v1149_v14 = vor.u32 %v1311_v8, %v1148_v7  ;;  %v1060_v49 = vld [vmem:[#allocation5] sm:$0xf] }
  0xbb   :  { %v1153_v21 = vor.u32 %v1310_v12, %v1150_v13  ;;  %v1133_v47 = vor.u32 %v1307_v37, %v1132_v34  ;;  %v1061_v61 = vor.u32 %v1289_v50, %v1060_v49  ;;  %v1334_v34 = vld [vmem:[%s1596_s7 + $0x70] sm:$0xff]  ;;  %v1324_v37 = vld [vmem:[%s1596_s7 + $0x20] sm:$0xff] }
  0xbc   :  { %v196_v17 = vpack.c.b16 %v194_v15, %v194_v15  ;;  %v197_v18 = vpack.c.b16 %v195_v16, %v195_v16  ;;  %659 = vmatpush.bf16.msrb.mxu3 %v1165_v52  ;;  %v1089_v15 = vor.u32 %v1294_v9, %v1086_v11  ;;  %v1076_v16 = vld [vmem:[#allocation5 + $0x20] sm:$0xf]  ;;  %v1330_v49 = vld [vmem:[%s1596_s7 + $0x50] sm:$0xff] }
  0xbd   :  { %687 = vmatpush.bf16.msra.mxu1 %v1153_v21 }
  0xbe   :  { %368 = vmatmul.bf16.vlgmr.msra.gmra.mxu2 %v196_v17  ;;  %381 = vmatmul.bf16.vlgmr.msra.gmra.mxu3 %v197_v18 }
  0xbf   :  { %394 = vmatmul.bf16.vlgmr.msrb.gmra.mxu0 %v196_v17  ;;  %407 = vmatmul.bf16.vlgmr.msrb.gmra.mxu1 %v197_v18  ;;  %v1293_v17 = vld [vmem:[#allocation5 + $0x24] sm:$0xf0]  ;;  %v1140_v18 = vld [vmem:[#allocation5 + $0xa0] sm:$0xf] }
  0xc0   :  { %660 = vmatpush.bf16.msrb.mxu3 %v1157_v62  ;;  %v1077_v28 = vor.u32 %v1293_v17, %v1076_v16  ;;  %674 = vmatpush.bf16.msra.mxu0 %v1089_v15  ;;  %v1141_v29 = vor.u32 %v1309_v22, %v1140_v18  ;;  %v1125_v62 = vor.u32 %v1305_v55, %v1124_v30  ;;  %v1321_v55 = vld [vmem:[%s1596_s7 + $0x8] sm:$0xff] }
  0xc1   :  { %688 = vmatpush.bf16.msra.mxu1 %v1145_v36  ;;  %v1333_v36 = vld [vmem:[%s1596_s7 + $0x68] sm:$0xff] }
  0xc2   :  { %649 = vmatpush.bf16.msrb.mxu2 %v1077_v28 }
  0xc4   :  { %661 = vmatpush.bf16.msrb.mxu3 %v1149_v14  ;;  %675 = vmatpush.bf16.msra.mxu0 %v1081_v31  ;;  %v1327_v31 = vld [vmem:[%s1596_s7 + $0x38] sm:$0xff] }
  0xc5   :  { %689 = vmatpush.bf16.msra.mxu1 %v1137_v54 }
  0xc6   :  { %650 = vmatpush.bf16.msrb.mxu2 %v1069_v46  ;;  %v473_v46 = vperm.slane %v471_v39, 0 }
  0xc8   :  { %662 = vmatpush.bf16.msrb.mxu3 %v1141_v29  ;;  %676 = vmatpush.bf16.msra.mxu0 %v1073_v48  ;;  %v1322_v48 = vld [vmem:[%s1596_s7 + $0x10] sm:$0xff] }
  0xc9   :  { %690 = vmatpush.bf16.msra.mxu1 %v1129_v2 }
  0xca   :  { %651 = vmatpush.bf16.msrb.mxu2 %v1061_v61  ;;  %v1328_v61 = vld [vmem:[%s1596_s7 + $0x40] sm:$0xff] }
  0xcc   :  { %663 = vmatpush.bf16.msrb.mxu3 %v1133_v47  ;;  %677 = vmatpush.bf16.msra.mxu0 %v1065_v63 }
  0xce   :  { %862 = vmatpush.bf16.msra.mxu2 %v1327_v31 }
  0xd0   :  { %664 = vmatpush.bf16.msrb.mxu3 %v1125_v62 }
  0xd2   :  { %863 = vmatpush.bf16.msra.mxu2 %v1326_v33 }
  0xd4   :  { %875 = vmatpush.bf16.msra.mxu3 %v1335_v32 }
  0xd8   :  { %876 = vmatpush.bf16.msra.mxu3 %v1334_v34 }
  0xdc   :  { %877 = vmatpush.bf16.msra.mxu3 %v1333_v36 }
  0xe0   :  { %878 = vmatpush.bf16.msra.mxu3 %v1332_v38 }
 0x13c   :  { %v395_v19 = vpop.f32.mrf.mxu0  ;;  %v408_v20 = vpop.f32.mrf.mxu1 }
 0x13d   :  { %v396_v35 = vadd.f32 %v395_v19, %v190_v43 }
 0x13f   :  { %v409_v43 = vadd.f32 %v408_v20, %v396_v35  ;;  %v1325_v35 = vld [vmem:[%s1596_s7 + $0x28] sm:$0xff] }
 0x140   :  { %864 = vmatpush.bf16.msra.mxu2 %v1325_v35 }
 0x141   :  { %v369_v40 = vpop.f32.mrf.mxu2  ;;  %v382_v41 = vpop.f32.mrf.mxu3 }
 0x142   :  { %v370_v45 = vadd.f32 %v369_v40, %v189_v27  ;;  %v474_v40 = vperm.slane %v471_v39, 1 }
 0x144   :  { %v383_v51 = vadd.f32 %v382_v41, %v370_v45  ;;  %v397_v52 = vpop.f32.mrf.mxu0  ;;  %v410_v53 = vpop.f32.mrf.mxu1  ;;  %865 = vmatpush.bf16.msra.mxu2 %v1324_v37  ;;  %v1331_v45 = vld [vmem:[%s1596_s7 + $0x58] sm:$0xff] }
 0x145   :  { %879 = vmatpush.bf16.msra.mxu3 %v1331_v45 }
 0x146   :  { %v412_v60 = vpack.c.bf16 %v409_v43, %v383_v51 }
 0x148   :  { %v413_v0 = vunpack.c.l.bf16 %v412_v60  ;;  %v414_v1 = vunpack.c.h.bf16 %v412_v60  ;;  %866 = vmatpush.bf16.msra.mxu2 %v1323_v44 }
 0x149   :  { %v371_v3 = vpop.f32.mrf.mxu2  ;;  %v384_v4 = vpop.f32.mrf.mxu3  ;;  %880 = vmatpush.bf16.msra.mxu3 %v1330_v49 }
 0x14a   :  { %v415_v5 = vmin.f32 %v413_v0, 0.0  ;;  %v416_v6 = vmin.f32 %v414_v1, 0.0  ;;  %vm435_vm4 = vcmp.gt.f32.partialorder %v413_v0, 0.0  ;;  %vm436_vm5 = vcmp.gt.f32.partialorder %v414_v1, 0.0 }
 0x14b   :  { %vm437_vm6 = vmpackc.low %vm436_vm5, %vm435_vm4 }
 0x14c   :  { %v417_v7 = vpack.c.bf16 %v416_v6, %v415_v5  ;;  %867 = vmatpush.bf16.msra.mxu2 %v1322_v48 }
 0x14d   :  { %881 = vmatpush.bf16.msra.mxu3 %v1329_v56 }
 0x14e   :  { %v418_v8 = vunpack.c.l.bf16 %v417_v7  ;;  %v419_v9 = vunpack.c.h.bf16 %v417_v7 }
 0x150   :  { %v420_v10 = vmul.f32 1.442695, %v418_v8  ;;  %v422_v11 = vmul.f32 1.442695, %v419_v9  ;;  %868 = vmatpush.bf16.msra.mxu2 %v1321_v55 }
 0x151   :  { %882 = vmatpush.bf16.msra.mxu3 %v1328_v61 }
 0x152   :  { %1346 = vpow2.f32 %v420_v10 }
 0x153   :  { %1348 = vpow2.f32 %v422_v11 }
 0x158   :  { %v1347_v12 = vpop.eup %1346 }
 0x159   :  { %v1349_v13 = vpop.eup %1348 }
 0x15a   :  { %v424_v14 = vpack.c.bf16 %v1349_v13, %v1347_v12 }
 0x15c   :  { %v425_v15 = vunpack.c.l.bf16 %v424_v14  ;;  %v426_v16 = vunpack.c.h.bf16 %v424_v14 }
 0x15e   :  { %v1056_v17 = vadd.f32 -1.0, %v425_v15  ;;  %v1057_v18 = vadd.f32 -1.0, %v426_v16 }
 0x160   :  { %v429_v19 = vpack.c.bf16 %v1057_v18, %v1056_v17 }
 0x162   :  { %v430_v20 = vunpack.c.l.bf16 %v429_v19  ;;  %v431_v21 = vunpack.c.h.bf16 %v429_v19 }
 0x164   :  { %v432_v22 = vmul.f32 1.671875, %v430_v20  ;;  %v433_v23 = vmul.f32 1.671875, %v431_v21 }
 0x166   :  { %v434_v24 = vpack.c.bf16 %v433_v23, %v432_v22 }
 0x168   :  { %v438_v25 = vsel %vm437_vm6, %v412_v60, %v434_v24  ;;  %v1320_v60 = vld [vmem:[%s1596_s7] sm:$0xff] }
 0x169   :  { %v478_v26 = vunpack.c.l.b16 %v438_v25  ;;  %v479_v27 = vunpack.c.h.b16 %v438_v25  ;;  %869 = vmatpush.bf16.msra.mxu2 %v1320_v60  ;;  %v1341_v25 = vld [vmem:[%s1597_s8] ss:$0 sm:$0xff] }
 0x16b   :  { %v480_v28 = vpack.c.b16 %v478_v26, %v478_v26  ;;  %v481_v29 = vpack.c.b16 %v479_v27, %v479_v27 }
 0x16d   :  { %652 = vmatmul.bf16.vlgmr.msrb.gmra.mxu2 %v480_v28  ;;  %665 = vmatmul.bf16.vlgmr.msrb.gmra.mxu3 %v481_v29 }
 0x16e   :  { %678 = vmatmul.bf16.vlgmr.msra.gmra.mxu0 %v480_v28  ;;  %691 = vmatmul.bf16.vlgmr.msra.gmra.mxu1 %v481_v29 }
 0x1eb   :  { %v679_v41 = vpop.f32.mrf.mxu0  ;;  %v692_v42 = vpop.f32.mrf.mxu1 }
 0x1ec   :  { %v680_v47 = vadd.f32 %v679_v41, %v474_v40 }
 0x1ee   :  { %v693_v51 = vadd.f32 %v692_v42, %v680_v47 }
 0x1f0   :  { %v653_v50 = vpop.f32.mrf.mxu2  ;;  %v666_v30 = vpop.f32.mrf.mxu3 }
 0x1f1   :  { %v654_v43 = vadd.f32 %v653_v50, %v473_v46 }
 0x1f3   :  { %v667_v52 = vadd.f32 %v666_v30, %v654_v43  ;;  %v681_v53 = vpop.f32.mrf.mxu0  ;;  %v694_v54 = vpop.f32.mrf.mxu1 }
 0x1f5   :  { %v696_v57 = vpack.c.bf16 %v693_v51, %v667_v52 }
 0x1f7   :  { %v697_v58 = vunpack.c.l.bf16 %v696_v57  ;;  %v698_v59 = vunpack.c.h.bf16 %v696_v57 }
 0x1f8   :  { %v655_v62 = vpop.f32.mrf.mxu2  ;;  %v668_v63 = vpop.f32.mrf.mxu3 }
 0x1f9   :  { %v699_v0 = vmin.f32 %v697_v58, 0.0  ;;  %v700_v1 = vmin.f32 %v698_v59, 0.0  ;;  %vm719_vm7 = vcmp.gt.f32.partialorder %v697_v58, 0.0  ;;  %vm720_vm8 = vcmp.gt.f32.partialorder %v698_v59, 0.0 }
 0x1fa   :  { %vm721_vm9 = vmpackc.low %vm720_vm8, %vm719_vm7 }
 0x1fb   :  { %v701_v2 = vpack.c.bf16 %v700_v1, %v699_v0 }
 0x1fd   :  { %v702_v3 = vunpack.c.l.bf16 %v701_v2  ;;  %v703_v4 = vunpack.c.h.bf16 %v701_v2 }
 0x1ff   :  { %v704_v5 = vmul.f32 1.442695, %v702_v3  ;;  %v706_v6 = vmul.f32 1.442695, %v703_v4 }
 0x201   :  { %1350 = vpow2.f32 %v704_v5 }
 0x202   :  { %1352 = vpow2.f32 %v706_v6 }
 0x207   :  { %v1351_v7 = vpop.eup %1350 }
 0x208   :  { %v1353_v8 = vpop.eup %1352 }
 0x209   :  { %v708_v9 = vpack.c.bf16 %v1353_v8, %v1351_v7 }
 0x20b   :  { %v709_v10 = vunpack.c.l.bf16 %v708_v9  ;;  %v710_v11 = vunpack.c.h.bf16 %v708_v9 }
 0x20d   :  { %v1186_v12 = vadd.f32 -1.0, %v709_v10  ;;  %v1187_v13 = vadd.f32 -1.0, %v710_v11 }
 0x20f   :  { %v713_v14 = vpack.c.bf16 %v1187_v13, %v1186_v12 }
 0x211   :  { %v714_v15 = vunpack.c.l.bf16 %v713_v14  ;;  %v715_v16 = vunpack.c.h.bf16 %v713_v14 }
 0x213   :  { %v716_v17 = vmul.f32 1.671875, %v714_v15  ;;  %v717_v18 = vmul.f32 1.671875, %v715_v16 }
 0x215   :  { %v718_v19 = vpack.c.bf16 %v717_v18, %v716_v17 }
 0x217   :  { %v722_v20 = vsel %vm721_vm9, %v696_v57, %v718_v19 }
 0x218   :  { %v760_v21 = vunpack.c.l.b16 %v722_v20  ;;  %v761_v22 = vunpack.c.h.b16 %v722_v20 }
 0x21a   :  { %v762_v23 = vpack.c.b16 %v760_v21, %v760_v21  ;;  %v763_v24 = vpack.c.b16 %v761_v22, %v761_v22 }
 0x21c   :  { %870 = vmatmul.bf16.vlgmr.msra.gmra.mxu2 %v762_v23  ;;  %883 = vmatmul.bf16.vlgmr.msra.gmra.mxu3 %v763_v24 }
 0x29f   :  { %v871_v26 = vpop.f32.mrf.mxu2  ;;  %v884_v27 = vpop.f32.mrf.mxu3 }
 0x2a0   :  { %v872_v28 = vadd.f32 %v1341_v25, %v871_v26 }
 0x2a2   :  { %v885_v29 = vadd.f32 %v884_v27, %v872_v28 }
 0x2a4   :  { %889 = vst.msk [vmem:[#allocation7] sm:$0x3] %vm888_vm10, %v885_v29 }
 0x2a5   :  { %900 = dma.vmem_to_hbm [thread:$0]  %s896_s23, 32, %s898_s25, [#allocation4]  }
 0x2a7   :  { %v873_v31 = vpop.f32.mrf.mxu2  ;;  %v886_v32 = vpop.f32.mrf.mxu3 }
 0x2a8   :  { %1430 = dma.done.wait [#allocation4], 32  }
 0x2a9   :  { %1431 = vsyncadd [#allocation4], 4294967264 }
 0x2aa   :  { %905 = vsyncpa [#allocation3], 1 }
 0x2ab   :  { %906 = vsyncpa [#allocation6], 1 }
 0x2ac   :  { %907 = vsyncpa [#allocation4], 1 }

</bundles_post_ra>
